<compile_context>
chip_gen: v7x
topology: tpu7x:2x2x1
jax: 0.10.0
libtpu: 0.0.40
codegen_flags: <defaults>
</compile_context>

<pallas_src>
import functools

import jax
import jax.numpy as jnp
from jax import lax
from jax.experimental import pallas as pl
from jax.experimental.pallas import tpu as pltpu


def _round_up(x, m):
    return ((x + m - 1) // m) * m


def _pick_block(seq_len, preferred):
    """Largest tile <= preferred that evenly divides seq_len."""
    for cand in (preferred, 512, 256, 128, 64, 32, 16, 8):
        if cand <= seq_len and seq_len % cand == 0:
            return cand
    # TODO(synk): ragged sequence lengths fall back to one full tile; add
    # kv-masking to support padded kv tiles instead.
    return seq_len


def _flash_self_attn_kernel(xq_ref, xkv_ref, wq_ref, wkv_ref, o_ref,
                            q_scr, m_scr, l_scr, acc_scr,
                            *, scale, d_pad, matmul_dtype):
    """One (batch, q_tile, kv_tile) grid step.

    xq_ref : (q_blk, d_in)        query-side rows of x
    xkv_ref: (kv_blk, d_in)       key/value-side rows of x
    wq_ref : (d_in, d_pad)        zero-padded W_query^T
    wkv_ref: (d_in, 2*d_pad)      zero-padded [W_key^T | W_value^T]
    o_ref  : (q_blk, d_pad)       padded context output (written at last kv step)
    """
    ki = pl.program_id(2)

    @pl.when(ki == 0)
    def _init():
        # Project Q once per (batch, q-tile); fold the 1/sqrt(d_out) scale in
        # here (O(S*d) multiplies instead of O(S^2) on the scores).
        q = jnp.dot(xq_ref[...], wq_ref[...],
                    preferred_element_type=jnp.float32)
        q_scr[...] = q * scale
        m_scr[...] = jnp.full_like(m_scr, -jnp.inf)
        l_scr[...] = jnp.zeros_like(l_scr)
        acc_scr[...] = jnp.zeros_like(acc_scr)

    # Fused K|V projection for this kv tile: one MXU matmul, lane-dense N.
    kv = jnp.dot(xkv_ref[...], wkv_ref[...],
                 preferred_element_type=jnp.float32)        # (kv_blk, 2*d_pad)
    k = kv[:, :d_pad]
    v = kv[:, d_pad:]

    # scores = (q*scale) @ k^T without materializing an explicit transpose:
    # NT contraction handled directly by the MXU.
    s = lax.dot_general(
        q_scr[...].astype(matmul_dtype), k.astype(matmul_dtype),
        dimension_numbers=(((1,), (1,)), ((), ())),
        preferred_element_type=jnp.float32)                 # (q_blk, kv_blk)

    # Online softmax (flash-attention accumulator).
    m_prev = m_scr[...]
    m_new = jnp.maximum(m_prev, jnp.max(s, axis=-1, keepdims=True))
    alpha = jnp.exp(m_prev - m_new)
    p = jnp.exp(s - m_new)
    l_scr[...] = alpha * l_scr[...] + jnp.sum(p, axis=-1, keepdims=True)
    acc_scr[...] = alpha * acc_scr[...] + jnp.dot(
        p.astype(matmul_dtype), v.astype(matmul_dtype),
        preferred_element_type=jnp.float32)
    m_scr[...] = m_new

    @pl.when(ki == pl.num_programs(2) - 1)
    def _finalize():
        # Deferred normalization: one O(S*d) multiply by the EUP reciprocal.
        inv_l = pl.reciprocal(l_scr[...], approx=True)
        o_ref[...] = (acc_scr[...] * inv_l).astype(o_ref.dtype)


def self_attention(x, w_query, w_key, w_value, *,
                   q_block=256, kv_block=256, use_bf16_matmul=False):
    """x: (B, S, d_in); w_*: (d_out, d_in) torch nn.Linear layout (bias=False).

    Returns (B, S, d_out), matching
        softmax((x Wq^T)(x Wk^T)^T / sqrt(d_out)) (x Wv^T).
    """
    B, S, d_in = x.shape
    d_out = w_query.shape[0]
    out_dtype = x.dtype

    # Pad the head dim to a multiple of 128 lanes (zero columns do not change
    # the math: they add 0 to the QK^T contraction and yield 0 output columns).
    d_pad = max(128, _round_up(d_out, 128))

    q_blk = _pick_block(S, q_block)
    kv_blk = _pick_block(S, kv_block)
    grid = (B, S // q_blk, S // kv_blk)

    def _prep_w(w):  # (d_out, d_in) -> zero-padded (d_in, d_pad)
        return jnp.pad(w.T, ((0, 0), (0, d_pad - d_out)))

    wq_p = _prep_w(w_query)                                       # (d_in, d_pad)
    wkv_p = jnp.concatenate([_prep_w(w_key), _prep_w(w_value)], axis=1)  # (d_in, 2*d_pad)

    if use_bf16_matmul:
        # v6e / v7x: bf16 MXU operands with f32 accumulation.
        x_in = x.astype(jnp.bfloat16)
        wq_p = wq_p.astype(jnp.bfloat16)
        wkv_p = wkv_p.astype(jnp.bfloat16)
        matmul_dtype = jnp.bfloat16
    else:
        x_in = x
        matmul_dtype = x.dtype

    scale = 1.0 / (d_out ** 0.5)   # reference scales by keys.shape[-1]**0.5 = d_out

    kernel = functools.partial(
        _flash_self_attn_kernel,
        scale=scale, d_pad=d_pad, matmul_dtype=matmul_dtype)

    out_padded = pl.pallas_call(
        kernel,
        out_shape=jax.ShapeDtypeStruct((B, S, d_pad), out_dtype),
        grid_spec=pltpu.PrefetchScalarGridSpec(
            num_scalar_prefetch=0,
            grid=grid,
            in_specs=[
                # query-side rows of x
                pl.BlockSpec((pl.Squeezed(), q_blk, d_in),
                             lambda b, qi, ki: (b, qi, 0)),
                # key/value-side rows of x
                pl.BlockSpec((pl.Squeezed(), kv_blk, d_in),
                             lambda b, qi, ki: (b, ki, 0)),
                pl.BlockSpec((d_in, d_pad), lambda b, qi, ki: (0, 0)),
                pl.BlockSpec((d_in, 2 * d_pad), lambda b, qi, ki: (0, 0)),
            ],
            out_specs=pl.BlockSpec((pl.Squeezed(), q_blk, d_pad),
                                   lambda b, qi, ki: (b, qi, 0)),
            scratch_shapes=[
                pltpu.VMEM((q_blk, d_pad), jnp.float32),   # q (pre-scaled)
                pltpu.VMEM((q_blk, 1), jnp.float32),       # running max m
                pltpu.VMEM((q_blk, 1), jnp.float32),       # running denom l
                pltpu.VMEM((q_blk, d_pad), jnp.float32),   # output accumulator
            ],
        ),
        compiler_params=pltpu.CompilerParams(
            dimension_semantics=("parallel", "parallel", "arbitrary"),
            vmem_limit_bytes=64 * 1024 * 1024,
        ),
    )(x_in, x_in, wq_p, wkv_p)

    # Drop the lane padding (cheap XLA slice outside the kernel).
    return out_padded[:, :, :d_out]


def self_attention_ref(x, w_query, w_key, w_value):
    """Pure-JAX reference mirroring the PyTorch forward exactly."""
    q = x @ w_query.T
    k = x @ w_key.T
    v = x @ w_value.T
    scores = q @ jnp.swapaxes(k, -2, -1)
    weights = jax.nn.softmax(scores / (k.shape[-1] ** 0.5), axis=-1)
    return weights @ v


if __name__ == "__main__":
    B, S, d_in, d_out = 2, 8, 32, 16

    key = jax.random.PRNGKey(0)
    kx, kq, kk, kv = jax.random.split(key, 4)

    x = jax.random.normal(kx, (B, S, d_in), dtype=jnp.float32)
    bound = 1.0 / (d_in ** 0.5)
    w_query = jax.random.uniform(kq, (d_out, d_in), jnp.float32, -bound, bound)
    w_key = jax.random.uniform(kk, (d_out, d_in), jnp.float32, -bound, bound)
    w_value = jax.random.uniform(kv, (d_out, d_in), jnp.float32, -bound, bound)

    ref = self_attention_ref(x, w_query, w_key, w_value)

    # f32 operands (default, matches the PyTorch module's dtype).
    out = jax.block_until_ready(self_attention(x, w_query, w_key, w_value))
    assert out.shape == (B, S, d_out)
    assert jnp.allclose(out, ref, atol=1e-2, rtol=1e-2), "f32 mismatch vs reference"

    # bf16 MXU-operand path (v6e/v7x optimization); looser tolerance.
    out_bf16 = jax.block_until_ready(
        self_attention(x, w_query, w_key, w_value, use_bf16_matmul=True))
    assert out_bf16.shape == (B, S, d_out)
    assert jnp.allclose(out_bf16, ref, atol=5e-2, rtol=5e-2), "bf16 mismatch vs reference"

    print("KERNEL_OK")
</pallas_src>

<mosaic_0001>
module attributes {stable_mosaic.version = 11 : i64} {
  func.func @_flash_self_attn_kernel(%arg0: i32, %arg1: i32, %arg2: i32, %arg3: memref<1x8x32xf32, #tpu.memory_space<vmem>>, %arg4: memref<1x8x32xf32, #tpu.memory_space<vmem>>, %arg5: memref<32x128xf32, #tpu.memory_space<vmem>>, %arg6: memref<32x256xf32, #tpu.memory_space<vmem>>, %arg7: memref<1x8x128xf32, #tpu.memory_space<vmem>>, %arg8: memref<8x128xf32, #tpu.memory_space<vmem>>, %arg9: memref<8x1xf32, #tpu.memory_space<vmem>>, %arg10: memref<8x1xf32, #tpu.memory_space<vmem>>, %arg11: memref<8x128xf32, #tpu.memory_space<vmem>>) attributes {dimension_semantics = [#tpu.dimension_semantics<parallel>, #tpu.dimension_semantics<parallel>, #tpu.dimension_semantics<arbitrary>], iteration_bounds = array<i64: 2, 1, 1>, scalar_prefetch = 0 : i64, scratch_operands = 4 : i64, tpu.core_type = #tpu.core_type<tc>, window_params = [{transform_indices = @transform_0, window_bounds = array<i64: 1, 8, 32>}, {transform_indices = @transform_1, window_bounds = array<i64: 1, 8, 32>}, {pipeline_mode = #tpu.pipeline_mode<synchronous>, transform_indices = @transform_2, window_bounds = array<i64: 32, 128>}, {pipeline_mode = #tpu.pipeline_mode<synchronous>, transform_indices = @transform_3, window_bounds = array<i64: 32, 256>}, {transform_indices = @transform_4, window_bounds = array<i64: 1, 8, 128>}]} {
    %c0_i32 = arith.constant 0 : i32
    %0 = arith.cmpi eq, %arg2, %c0_i32 : i32
    %1 = arith.extui %0 : i1 to i32
    %c0_i32_0 = arith.constant 0 : i32
    %2 = arith.cmpi ne, %1, %c0_i32_0 : i32
    scf.if %2 {
      %c0_25 = arith.constant 0 : index
      %c0_26 = arith.constant 0 : index
      %c0_27 = arith.constant 0 : index
      %36 = vector.load %arg3[%c0_25, %c0_26, %c0_27] : memref<1x8x32xf32, #tpu.memory_space<vmem>>, vector<1x8x32xf32>
      %37 = vector.shape_cast %36 : vector<1x8x32xf32> to vector<8x32xf32>
      %c0_28 = arith.constant 0 : index
      %c0_29 = arith.constant 0 : index
      %38 = vector.load %arg5[%c0_28, %c0_29] : memref<32x128xf32, #tpu.memory_space<vmem>>, vector<32x128xf32>
      %cst_30 = arith.constant dense<0.000000e+00> : vector<8x128xf32>
      %39 = tpu.matmul %37, %38, %cst_30 {dimension_numbers = #tpu.dot_dimension_numbers<[1], [0], [0], [1], [0, 0, 1, 1], [], []>} : vector<8x32xf32>, vector<32x128xf32>, vector<8x128xf32> -> vector<8x128xf32>
      %cst_31 = arith.constant 2.500000e-01 : f32
      %40 = vector.broadcast %cst_31 : f32 to vector<8x128xf32>
      %41 = arith.mulf %39, %40 : vector<8x128xf32>
      %c0_32 = arith.constant 0 : index
      %c0_33 = arith.constant 0 : index
      %42 = vector.load %arg8[%c0_32, %c0_33] : memref<8x128xf32, #tpu.memory_space<vmem>>, vector<8x128xf32>
      tpu.vector_store %arg8[%c0_32, %c0_33], %41 {strides = array<i32>} : memref<8x128xf32, #tpu.memory_space<vmem>>, vector<8x128xf32>,
      %cst_34 = arith.constant 0xFF800000 : f32
      %43 = vector.broadcast %cst_34 : f32 to vector<8x1xf32>
      %c0_35 = arith.constant 0 : index
      %c0_36 = arith.constant 0 : index
      %44 = vector.load %arg9[%c0_35, %c0_36] : memref<8x1xf32, #tpu.memory_space<vmem>>, vector<8x1xf32>
      tpu.vector_store %arg9[%c0_35, %c0_36], %43 {strides = array<i32>} : memref<8x1xf32, #tpu.memory_space<vmem>>, vector<8x1xf32>,
      %cst_37 = arith.constant 0.000000e+00 : f32
      %45 = vector.broadcast %cst_37 : f32 to vector<8x1xf32>
      %c0_38 = arith.constant 0 : index
      %c0_39 = arith.constant 0 : index
      %46 = vector.load %arg10[%c0_38, %c0_39] : memref<8x1xf32, #tpu.memory_space<vmem>>, vector<8x1xf32>
      tpu.vector_store %arg10[%c0_38, %c0_39], %45 {strides = array<i32>} : memref<8x1xf32, #tpu.memory_space<vmem>>, vector<8x1xf32>,
      %cst_40 = arith.constant 0.000000e+00 : f32
      %47 = vector.broadcast %cst_40 : f32 to vector<8x128xf32>
      %c0_41 = arith.constant 0 : index
      %c0_42 = arith.constant 0 : index
      %48 = vector.load %arg11[%c0_41, %c0_42] : memref<8x128xf32, #tpu.memory_space<vmem>>, vector<8x128xf32>
      tpu.vector_store %arg11[%c0_41, %c0_42], %47 {strides = array<i32>} : memref<8x128xf32, #tpu.memory_space<vmem>>, vector<8x128xf32>,
    } else {
    }
    %c0 = arith.constant 0 : index
    %c0_1 = arith.constant 0 : index
    %c0_2 = arith.constant 0 : index
    %3 = vector.load %arg4[%c0, %c0_1, %c0_2] : memref<1x8x32xf32, #tpu.memory_space<vmem>>, vector<1x8x32xf32>
    %4 = vector.shape_cast %3 : vector<1x8x32xf32> to vector<8x32xf32>
    %c0_3 = arith.constant 0 : index
    %c0_4 = arith.constant 0 : index
    %5 = vector.load %arg6[%c0_3, %c0_4] : memref<32x256xf32, #tpu.memory_space<vmem>>, vector<32x256xf32>
    %cst = arith.constant dense<0.000000e+00> : vector<8x256xf32>
    %6 = tpu.matmul %4, %5, %cst {dimension_numbers = #tpu.dot_dimension_numbers<[1], [0], [0], [1], [0, 0, 1, 1], [], []>} : vector<8x32xf32>, vector<32x256xf32>, vector<8x256xf32> -> vector<8x256xf32>
    %7 = vector.extract_strided_slice %6 {offsets = [0, 0], sizes = [8, 128], strides = [1, 1]} : vector<8x256xf32> to vector<8x128xf32>
    %8 = vector.extract_strided_slice %6 {offsets = [0, 128], sizes = [8, 128], strides = [1, 1]} : vector<8x256xf32> to vector<8x128xf32>
    %c0_5 = arith.constant 0 : index
    %c0_6 = arith.constant 0 : index
    %9 = vector.load %arg8[%c0_5, %c0_6] : memref<8x128xf32, #tpu.memory_space<vmem>>, vector<8x128xf32>
    %cst_7 = arith.constant dense<0.000000e+00> : vector<8x8xf32>
    %10 = tpu.matmul %9, %7, %cst_7 {dimension_numbers = #tpu.dot_dimension_numbers<[1], [1], [0], [0], [0, 0, 1, 0], [], []>} : vector<8x128xf32>, vector<8x128xf32>, vector<8x8xf32> -> vector<8x8xf32>
    %c0_8 = arith.constant 0 : index
    %c0_9 = arith.constant 0 : index
    %11 = vector.load %arg9[%c0_8, %c0_9] : memref<8x1xf32, #tpu.memory_space<vmem>>, vector<8x1xf32>
    %cst_10 = arith.constant dense<0xFF800000> : vector<8xf32>
    %12 = vector.multi_reduction <maximumf>, %10, %cst_10 [1] : vector<8x8xf32> to vector<8xf32>
    %13 = vector.shape_cast %12 : vector<8xf32> to vector<8x1xf32>
    %14 = arith.maximumf %11, %13 : vector<8x1xf32>
    %15 = arith.subf %11, %14 : vector<8x1xf32>
    %16 = math.exp %15 : vector<8x1xf32>
    %17 = vector.broadcast %14 : vector<8x1xf32> to vector<8x8xf32>
    %18 = arith.subf %10, %17 : vector<8x8xf32>
    %19 = math.exp %18 : vector<8x8xf32>
    %c0_11 = arith.constant 0 : index
    %c0_12 = arith.constant 0 : index
    %20 = vector.load %arg10[%c0_11, %c0_12] : memref<8x1xf32, #tpu.memory_space<vmem>>, vector<8x1xf32>
    %21 = arith.mulf %16, %20 : vector<8x1xf32>
    %cst_13 = arith.constant dense<0.000000e+00> : vector<8xf32>
    %22 = vector.multi_reduction <add>, %19, %cst_13 [1] : vector<8x8xf32> to vector<8xf32>
    %23 = vector.shape_cast %22 : vector<8xf32> to vector<8x1xf32>
    %24 = arith.addf %21, %23 : vector<8x1xf32>
    %c0_14 = arith.constant 0 : index
    %c0_15 = arith.constant 0 : index
    %25 = vector.load %arg10[%c0_14, %c0_15] : memref<8x1xf32, #tpu.memory_space<vmem>>, vector<8x1xf32>
    tpu.vector_store %arg10[%c0_14, %c0_15], %24 {strides = array<i32>} : memref<8x1xf32, #tpu.memory_space<vmem>>, vector<8x1xf32>,
    %c0_16 = arith.constant 0 : index
    %c0_17 = arith.constant 0 : index
    %26 = vector.load %arg11[%c0_16, %c0_17] : memref<8x128xf32, #tpu.memory_space<vmem>>, vector<8x128xf32>
    %27 = vector.broadcast %16 : vector<8x1xf32> to vector<8x128xf32>
    %28 = arith.mulf %27, %26 : vector<8x128xf32>
    %cst_18 = arith.constant dense<0.000000e+00> : vector<8x128xf32>
    %29 = tpu.matmul %19, %8, %cst_18 {dimension_numbers = #tpu.dot_dimension_numbers<[1], [0], [0], [1], [0, 0, 1, 1], [], []>} : vector<8x8xf32>, vector<8x128xf32>, vector<8x128xf32> -> vector<8x128xf32>
    %30 = arith.addf %28, %29 : vector<8x128xf32>
    %c0_19 = arith.constant 0 : index
    %c0_20 = arith.constant 0 : index
    %31 = vector.load %arg11[%c0_19, %c0_20] : memref<8x128xf32, #tpu.memory_space<vmem>>, vector<8x128xf32>
    tpu.vector_store %arg11[%c0_19, %c0_20], %30 {strides = array<i32>} : memref<8x128xf32, #tpu.memory_space<vmem>>, vector<8x128xf32>,
    %c0_21 = arith.constant 0 : index
    %c0_22 = arith.constant 0 : index
    %32 = vector.load %arg9[%c0_21, %c0_22] : memref<8x1xf32, #tpu.memory_space<vmem>>, vector<8x1xf32>
    tpu.vector_store %arg9[%c0_21, %c0_22], %14 {strides = array<i32>} : memref<8x1xf32, #tpu.memory_space<vmem>>, vector<8x1xf32>,
    %c0_i32_23 = arith.constant 0 : i32
    %33 = arith.cmpi eq, %arg2, %c0_i32_23 : i32
    %34 = arith.extui %33 : i1 to i32
    %c0_i32_24 = arith.constant 0 : i32
    %35 = arith.cmpi ne, %34, %c0_i32_24 : i32
    scf.if %35 {
      %c0_25 = arith.constant 0 : index
      %c0_26 = arith.constant 0 : index
      %36 = vector.load %arg10[%c0_25, %c0_26] : memref<8x1xf32, #tpu.memory_space<vmem>>, vector<8x1xf32>
      %37 = tpu.reciprocal %36 {approx = true} : vector<8x1xf32> -> vector<8x1xf32>
      %c0_27 = arith.constant 0 : index
      %c0_28 = arith.constant 0 : index
      %38 = vector.load %arg11[%c0_27, %c0_28] : memref<8x128xf32, #tpu.memory_space<vmem>>, vector<8x128xf32>
      %39 = vector.broadcast %37 : vector<8x1xf32> to vector<8x128xf32>
      %40 = arith.mulf %38, %39 : vector<8x128xf32>
      %c0_29 = arith.constant 0 : index
      %c0_30 = arith.constant 0 : index
      %c0_31 = arith.constant 0 : index
      %41 = vector.load %arg7[%c0_29, %c0_30, %c0_31] : memref<1x8x128xf32, #tpu.memory_space<vmem>>, vector<1x8x128xf32>
      %42 = vector.shape_cast %41 : vector<1x8x128xf32> to vector<8x128xf32>
      %43 = vector.shape_cast %40 : vector<8x128xf32> to vector<1x8x128xf32>
      tpu.vector_store %arg7[%c0_29, %c0_30, %c0_31], %43 {strides = array<i32>} : memref<1x8x128xf32, #tpu.memory_space<vmem>>, vector<1x8x128xf32>,
    } else {
    }
    return
  }
  func.func @transform_0(%arg0: i32, %arg1: i32, %arg2: i32) -> (i32, i32, i32) {
    %c0_i32 = arith.constant 0 : i32
    %c0_i32_0 = arith.constant 0 : i32
    return %arg0, %arg1, %c0_i32 : i32, i32, i32
  }
  func.func @transform_1(%arg0: i32, %arg1: i32, %arg2: i32) -> (i32, i32, i32) {
    %c0_i32 = arith.constant 0 : i32
    %c0_i32_0 = arith.constant 0 : i32
    return %arg0, %arg2, %c0_i32 : i32, i32, i32
  }
  func.func @transform_2(%arg0: i32, %arg1: i32, %arg2: i32) -> (i32, i32) {
    %c0_i32 = arith.constant 0 : i32
    %c0_i32_0 = arith.constant 0 : i32
    %c0_i32_1 = arith.constant 0 : i32
    return %c0_i32, %c0_i32_0 : i32, i32
  }
  func.func @transform_3(%arg0: i32, %arg1: i32, %arg2: i32) -> (i32, i32) {
    %c0_i32 = arith.constant 0 : i32
    %c0_i32_0 = arith.constant 0 : i32
    %c0_i32_1 = arith.constant 0 : i32
    return %c0_i32, %c0_i32_0 : i32, i32
  }
  func.func @transform_4(%arg0: i32, %arg1: i32, %arg2: i32) -> (i32, i32, i32) {
    %c0_i32 = arith.constant 0 : i32
    %c0_i32_0 = arith.constant 0 : i32
    return %arg0, %arg1, %c0_i32 : i32, i32, i32
  }
}

</mosaic_0001>

<bundles_post_ra>
// kernel: tpu_custom_call.1
= control target key start
LH: loop header
LB: loop body
LE: loop exit
PB: predicated region body
PF: predicated region fallthrough
CT: control target
= control target key end

     0   :  { %s1538_s0 = inlined_call_operand.hbm [shape: f32[2,8,32], index: 0, kind: input, shape index: {}]   ;;  %s1539_s1 = inlined_call_operand.hbm [shape: f32[2,8,32], index: 1, kind: input, shape index: {}]   ;;  %s1540_s2 = inlined_call_operand.hbm [shape: f32[32,128], index: 2, kind: input, shape index: {}]   ;;  %s1541_s3 = inlined_call_operand.hbm [shape: f32[32,256], index: 3, kind: input, shape index: {}]   ;;  %s1542_s4 = inlined_call_operand.hbm [shape: f32[2,8,128], index: 4, kind: output, shape index: {}]  }
   0x1   :  { %1548 = sst [smem:[#allocation21_spill]] %s1540_s2 }
   0x2   :  { %1549 = sst [smem:[#allocation22_spill]] %s1541_s3 }
   0x3   :  { %9 = vsyncpa [#allocation7], 0 }
   0x4   :  { %11 = vsyncpa [#allocation7 + $0x1], 0 }
   0x5   :  { %12 = vsyncpa [#allocation10], 0 }
   0x6   :  { %14 = vsyncpa [#allocation10 + $0x1], 0 }
   0x7   :  { %15 = vsyncpa [#allocation13], 0 }
   0x8   :  { %16 = vsyncpa [#allocation8], 0 }
   0x9   :  { %18 = vsyncpa [#allocation8 + $0x1], 0  ;;  %s1235_s15 = smov 0   ;;  %s1237_s16 = smov 0  }
   0xa   :  { %s1239_s17 = smov 0   ;;  %s1241_s18 = smov 0  }
   0xb   :  { %s1243_s19 = smov 0   ;;  %s1245_s20 = smov 0  }
   0xc LB: > { %s1266_s21 = sadd.s32 4294967295, %s1194_s20   ;;  %s813_s22 = sadd.s32 4294967294, %s1194_s20   ;;  %s1194_s20 = sphi %s1245_s20, %s24_s20   ;;  %s1190_s19 = sphi %s1243_s19, %s1574_s19   ;;  %s1186_s18 = sphi %s1241_s18, %s1573_s18   ;;  %s1182_s17 = sphi %s1239_s17, %s1572_s17   ;;  %s1178_s16 = sphi %s1237_s16, %s1571_s16   ;;  %s1174_s15 = sphi %s1235_s15, %s1570_s15  }
   0xd   : > { %p65_p0 = scmp.ne.s32.totalorder %s1178_s16, %s1174_s15  ;;  %p1543_p1 = scmp.eq.s32.totalorder %s1266_s21, 0 }
   0xe   : > { %p167_p3 = scmp.eq.s32.totalorder %s813_s22, 1  ;;  %p814_p5 = scmp.ge.s32.totalorder %s1194_s20, 1 }
   0xf   : > { %p1275_p4 = por %p1543_p1, %p65_p0  ;;  %p174_p7 = scmp.lt.s32.totalorder %s1194_s20, 3 }
  0x10   : > { %p1280_p6 = por %p167_p3, %p65_p0  ;;  %s1196_s26 = smov [#allocation11]  }
  0x11   : > { %s1550_s23 = scalar_select %p1275_p4, 1, 0 }
  0x12   : > { %s1551_s24 = scalar_select %p1280_p6, 1, 0 }
  0x13   : > { %p1285_p8 = pnand %p814_p5, %p174_p7  ;;  %s186_s27 = sshll.u32 %s1196_s26, 4  ;;  %s1289_s27 = int_to_ptr.vmem [resolvable:$true] %s186_s27 }
  0x14   : > { %s1197_s29 = smov [#allocation12]   ;;  %s1554_s2 = sld [smem:[#allocation21_spill]] }
  0x15   : > { %s1552_s25 = scalar_select %p1285_p8, 1, 0 }
  0x16   : > { %p893_p9 = pneg %p1285_p8  ;;  %s199_s30 = sshll.u32 %s1197_s29, 4  ;;  %s1300_s30 = int_to_ptr.vmem [resolvable:$true] %s199_s30 }
  0x18   : > { %p1296_p11 = pnand %p893_p9, %p1543_p1 }
  0x1a   : > { %s984_s7 = scalar_lea.hbm %s1554_s2, 512  ;;  %p986_p13 = pneg %p1296_p11 }
  0x1b   : > { %p985_p12 = scmp.ne.s32.totalorder %s1554_s2, %s984_s7  ;;  %p991_p5 = scmp.lt.u32.totalorder %s984_s7, %s1554_s2 }
  0x1d   : > { %p987_p0 = pnand %p986_p13, %p985_p12 }
  0x1f   : > { %p988_p3 = pneg %p987_p0 }
  0x21   : > { %p993_p7 = pnand %p991_p5, %p988_p3 }
  0x23   : > { %996 = shalt.err (!%p993_p7)
}
  0x24   : > { %s997_s12 = scalar_lea.vmem %s1289_s27, 512  ;;  %p1005_p2 = scmp.lt.s32.totalorder %s1289_s27, %s1289_s27 }
  0x25   : > { %p998_p9 = scmp.ne.s32.totalorder %s1289_s27, %s997_s12  ;;  %p1006_p12 = scmp.lt.s32.totalorder %s997_s12, %s997_s12 }
  0x27   : > { %p1000_p10 = pnand %p998_p9, %p986_p13  ;;  %p1007_p0 = por %p1006_p12, %p1005_p2 }
  0x29   : > { %p1001_p1 = pneg %p1000_p10 }
  0x2b   : > { %p1008_p6 = pnand %p1007_p0, %p1001_p1 }
  0x2d   : > { %1011 = shalt.err (!%p1008_p6)
}
  0x2e   : > { %s1198_s13 = smov 128   ;;  %s1199_s14 = smov 8  }
  0x2f   : > { %896 = dma.hbm_to_vmem [thread:$0]  (!%p1296_p11), %s1554_s2, 512, %s1289_s27, [#allocation10], %s1198_s13, %s1198_s13, %s1199_s14  }
  0x30   : > { %s1555_s3 = sld [smem:[#allocation22_spill]] }
  0x36   : > { %s1012_s6 = scalar_lea.hbm %s1555_s3, 1024 }
  0x37   : > { %p1013_p2 = scmp.ne.s32.totalorder %s1555_s3, %s1012_s6  ;;  %p1019_p10 = scmp.lt.u32.totalorder %s1012_s6, %s1555_s3 }
  0x39   : > { %p1015_p1 = pnand %p1013_p2, %p986_p13 }
  0x3b   : > { %p1016_p6 = pneg %p1015_p1 }
  0x3d   : > { %p1021_p3 = pnand %p1019_p10, %p1016_p6 }
  0x3f   : > { %1024 = shalt.err (!%p1021_p3)
}
  0x40   : > { %s1025_s27 = scalar_lea.vmem %s1300_s30, 1024  ;;  %p1033_p12 = scmp.lt.s32.totalorder %s1300_s30, %s1300_s30 }
  0x41   : > { %p1026_p5 = scmp.ne.s32.totalorder %s1300_s30, %s1025_s27  ;;  %p1034_p0 = scmp.lt.s32.totalorder %s1025_s27, %s1025_s27 }
  0x43   : > { %p1028_p7 = pnand %p1026_p5, %p986_p13  ;;  %p1035_p2 = por %p1034_p0, %p1033_p12 }
  0x45   : > { %p1029_p9 = pneg %p1028_p7 }
  0x47   : > { %p1036_p1 = pnand %p1035_p2, %p1029_p9 }
  0x49   : > { %1039 = shalt.err (!%p1036_p1)
}
  0x4a   : > { %s1200_s11 = smov 256   ;;  %s1201_s12 = smov 16  }
  0x4b   : > { %899 = dma.hbm_to_vmem [thread:$0]  (!%p1296_p11), %s1555_s3, 1024, %s1300_s30, [#allocation13], %s1200_s11, %s1200_s11, %s1201_s12  }
  0x4c   : > { %s43_s22 = sadd.s32 1, %s1190_s19  ;;  %s52_s26 = sadd.s32 1, %s1182_s17 }
  0x4d   : > { %p45_p13 = scmp.ge.s32.totalorder %s43_s22, 2  ;;  %p59_p6 = scmp.ne.s32.totalorder %s1182_s17, %s1178_s16 }
  0x4e   : > { %p60_p10 = scmp.eq.s32.totalorder %s1194_s20, 0  ;;  %p913_p3 = scmp.lt.s32.totalorder %s1194_s20, 2 }
  0x4f   : > { %s1576_s22 = smov (%p45_p13, %s43_s22), 0  ;;  %p1557_p7 = scmp.eq.s32.totalorder %s1266_s21, 1 }
  0x50   : > { %1556 = sst [smem:[#allocation20_spill]] %s1576_s22  ;;  %p61_p5 = por %p60_p10, %p59_p6 }
  0x51   : > { %p1364_p9 = por %p1557_p7, %p59_p6  ;;  %s47_s28 = ssub.s32 %s1190_s19, %s1576_s22 }
  0x52   : > { %s213_s5 = sand.u32 1, %s1182_s17   ;;  %p50_p12 = scmp.eq.s32.totalorder %s47_s28, 0 }
  0x53   : > { %s1558_s29 = scalar_select %p1364_p9, 1, 0 }
  0x54   : > { %s1371_s30 = sshll.u32 %s213_s5, 3  ;;  %s819_s6 = sshll.u32 %s1190_s19, 7 }
  0x55   : > { %s1375_s7 = scalar_select %p50_p12, %s1182_s17, %s52_s26  }
  0x56   : > { %s1380_s10 = scalar_lea.hbm %s1538_s0, %s819_s6  ;;  %s217_s27 = scalar_lea.vmem [#allocation6], %s1371_s30 }
  0x57   : > { %s225_s11 = sshll.u32 %s217_s27, 4  ;;  %p1385_p11 = pnand %p913_p3, %p61_p5  ;;  %s1389_s11 = int_to_ptr.vmem [resolvable:$true] %s225_s11 }
  0x58   : > { %s1394_s26 = scalar_lea.hbm %s1539_s1, %s819_s6  ;;  %s214_s28 = scalar_lea.sflag [#allocation7], %s213_s5 }
  0x59   : > { %s1040_s8 = scalar_lea.hbm %s1380_s10, 128  ;;  %p1042_p2 = pneg %p1385_p11 }
  0x5a   : > { %p1041_p0 = scmp.ne.s32.totalorder %s1380_s10, %s1040_s8  ;;  %s1045_s2 = scalar_lea.hbm %s1538_s0, 256 }
  0x5b   : > { %p1046_p6 = scmp.lt.u32.totalorder %s1380_s10, %s1538_s0  ;;  %p1047_p10 = scmp.lt.u32.totalorder %s1045_s2, %s1040_s8 }
  0x5c   : > { %p1043_p1 = pnand %p1042_p2, %p1041_p0  ;;  %p1049_p5 = scmp.lt.u32.totalorder %s1040_s8, %s1380_s10 }
  0x5d   : > { %p1048_p3 = por %p1047_p10, %p1046_p6 }
  0x5e   : > { %p1044_p13 = pneg %p1043_p1 }
  0x5f   : > { %p1050_p7 = por %p1049_p5, %p1048_p3 }
  0x61   : > { %p1051_p12 = pnand %p1050_p7, %p1044_p13 }
  0x63   : > { %1054 = shalt.err (!%p1051_p12)
}
  0x64   : > { %s1055_s5 = scalar_lea.vmem %s1389_s11, 128  ;;  %s1202_s6 = smov [#allocation6]  }
  0x65   : > { %p1056_p0 = scmp.ne.s32.totalorder %s1389_s11, %s1055_s5  ;;  %s1060_s13 = sshll.u32 %s1202_s6, 4  ;;  %s1061_s13 = int_to_ptr.vmem [resolvable:$false] %s1060_s13 }
  0x66   : > { %s1062_s3 = scalar_lea.vmem %s1061_s13, 256  ;;  %p1063_p4 = scmp.lt.s32.totalorder %s1389_s11, %s1061_s13 }
  0x67   : > { %p1058_p1 = pnand %p1056_p0, %p1042_p2  ;;  %p1064_p6 = scmp.lt.s32.totalorder %s1062_s3, %s1055_s5 }
  0x69   : > { %p1059_p9 = pneg %p1058_p1  ;;  %p1065_p10 = por %p1064_p6, %p1063_p4 }
  0x6b   : > { %p1066_p3 = pnand %p1065_p10, %p1059_p9 }
  0x6d   : > { %1069 = shalt.err (!%p1066_p3)
}
  0x6e   : > { %903 = dma.hbm_to_vmem [thread:$0]  (!%p1385_p11), %s1380_s10, 128, %s1389_s11, %s214_s28  }
  0x6f   : > { %s232_s2 = sand.u32 1, %s1194_s20   ;;  %s236_s22 = scalar_lea.vmem [#allocation9], %s1371_s30 }
  0x70   : > { %s244_s14 = sshll.u32 %s236_s22, 4  ;;  %s233_s8 = scalar_lea.sflag [#allocation10], %s232_s2  ;;  %s245_s14 = int_to_ptr.vmem [resolvable:$true] %s244_s14 }
  0x71   : > { %s1070_s9 = scalar_lea.hbm %s1394_s26, 128  ;;  %s1075_s6 = scalar_lea.hbm %s1539_s1, 256 }
  0x72   : > { %p1071_p4 = scmp.ne.s32.totalorder %s1394_s26, %s1070_s9  ;;  %p1076_p5 = scmp.lt.u32.totalorder %s1394_s26, %s1539_s1 }
  0x73   : > { %p1077_p7 = scmp.lt.u32.totalorder %s1075_s6, %s1070_s9  ;;  %p1079_p0 = scmp.lt.u32.totalorder %s1070_s9, %s1394_s26 }
  0x74   : > { %p1073_p9 = pnand %p1071_p4, %p1042_p2 }
  0x75   : > { %p1078_p12 = por %p1077_p7, %p1076_p5 }
  0x76   : > { %p1074_p13 = pneg %p1073_p9 }
  0x77   : > { %p1080_p1 = por %p1079_p0, %p1078_p12 }
  0x79   : > { %p1081_p6 = pnand %p1080_p1, %p1074_p13 }
  0x7b   : > { %1084 = shalt.err (!%p1081_p6)
}
  0x7c   : > { %s1085_s30 = scalar_lea.vmem %s245_s14, 128  ;;  %s1203_s10 = smov [#allocation9]  }
  0x7d   : > { %p1086_p10 = scmp.ne.s32.totalorder %s245_s14, %s1085_s30  ;;  %s1090_s11 = sshll.u32 %s1203_s10, 4  ;;  %s1091_s11 = int_to_ptr.vmem [resolvable:$false] %s1090_s11 }
  0x7e   : > { %s1092_s28 = scalar_lea.vmem %s1091_s11, 256  ;;  %p1093_p9 = scmp.lt.s32.totalorder %s245_s14, %s1091_s11 }
  0x7f   : > { %p1088_p3 = pnand %p1086_p10, %p1042_p2  ;;  %p1094_p8 = scmp.lt.s32.totalorder %s1092_s28, %s1085_s30 }
  0x81   : > { %p1089_p4 = pneg %p1088_p3  ;;  %p1095_p5 = por %p1094_p8, %p1093_p9 }
  0x83   : > { %p1096_p7 = pnand %p1095_p5, %p1089_p4 }
  0x85   : > { %1099 = shalt.err (!%p1096_p7)
}
  0x86   : > { %906 = dma.hbm_to_vmem [thread:$0]  (!%p1385_p11), %s1394_s26, 128, %s245_s14, %s233_s8  }
  0x87   : > { %p1560_p13 = scmp.ne.s32.totalorder %s1552_s25, 0 }
  0x88   : > { %s1445_s2 = sand.u32 (!%p1560_p13), 1, %s1178_s16   ;;  %p1561_p8 = scmp.ne.s32.totalorder (!%p1560_p13), %s1550_s23, 0 }
  0x89   : > { %253 = sbr.rel (%p1560_p13) target bundleno = 1190 (0x4a6), region = 36  ;;  %s1448_s22 = sshll.u32 (!%p1560_p13), %s1445_s2, 3 }
  0x8a   : > { %s256_s9 = scalar_lea.sflag (!%p1560_p13), [#allocation7], %s1445_s2  ;;  %s259_s27 = scalar_lea.vmem (!%p1560_p13), [#allocation6], %s1448_s22 }
  0x90   : > { %1153 = dma.done.wait (%p1561_p8), %s256_s9, 128  }
  0x91   : > { %1155 = vsyncadd (%p1561_p8), %s256_s9, 4294967168  ;;  %s264_s25 = sand.u32 1, %s1266_s21   ;;  %s268_s26 = scalar_lea.vmem [#allocation9], %s1448_s22 }
  0x92   : > { %s265_s12 = scalar_lea.sflag [#allocation10], %s264_s25 }
  0x93   : > { %1157 = dma.done.wait (%p1561_p8), %s265_s12, 128  }
  0x94   : > { %1159 = vsyncadd (%p1561_p8), %s265_s12, 4294967168  ;;  %p1562_p11 = scmp.eq.s32.totalorder %s1266_s21, 0 }
  0x96   : > { %1161 = dma.done.wait (%p1562_p11), [#allocation10], 512   ;;  %p1563_p2 = pmov %p1562_p11 }
  0x98   : > { %1163 = vsyncadd (%p1563_p2), [#allocation10], 4294966784  ;;  %p1564_p12 = pmov %p1563_p2 }
  0x99   : > { %p1565_p0 = pmov %p1563_p2 }
  0x9a   : > { %1165 = dma.done.wait (%p1564_p12), [#allocation13], 1024  }
  0x9b   : > { %1167 = vsyncadd (%p1565_p0), [#allocation13], 4294966272  ;;  %v1204_v0 = vmov 0.0|0.0   ;;  %v1205_v1 = vmov 0.0   ;;  %vm1206_vm0 = vmmov 0   ;;  %v397_v2 = vld [vmem:[#allocation12 + $0x8] sm:$0xff] }
  0x9c   : > { %865 = vmatprep.subr.bf16.mxu0 %v1204_v0  ;;  %472 = vmatprep.mubr.f32.mxu1 %v1205_v1  ;;  %v399_v3 = vld [vmem:[#allocation12 + $0x18] sm:$0xff]  ;;  %v396_v4 = vld [vmem:[#allocation12] sm:$0xff]  ;;  %v398_v6 = vld [vmem:[#allocation12 + $0x10] sm:$0xff]  ;;  %vm315_vm1 = vcmask 261120   ;;  %vm391_vm2 = vcmask 7168   ;;  %v1207_v27 = vmov -inf  }
  0x9d   : > { %852 = vmatprep.mubr.msk.f32.mxu0 %vm1206_vm0, %v1205_v1  ;;  %v871_v5 = vpack.c.bf16 %v399_v3, %v397_v2  ;;  %v311_v7 = vld [vmem:[#allocation11] sm:$0xff]  ;;  %v312_v8 = vld [vmem:[#allocation11 + $0x8] sm:$0xff]  ;;  %v873_v9 = vpack.c.bf16 %v398_v6, %v396_v4  ;;  %v403_v12 = vld [vmem:[#allocation12 + $0x38] sm:$0xff]  ;;  %392 = vst.msk [vmem:[#allocation3] sm:$0xff] %vm391_vm2, %v1207_v27  ;;  %vm551_vm3 = vcmask 64512   ;;  %v1208_v31 = vmov 0  }
  0x9e   : > { %v866_v10 = vpack.c.bf16 %v312_v8, %v311_v7  ;;  %v401_v11 = vld [vmem:[#allocation12 + $0x28] sm:$0xff]  ;;  %v400_v13 = vld [vmem:[#allocation12 + $0x20] sm:$0xff]  ;;  %v402_v15 = vld [vmem:[#allocation12 + $0x30] sm:$0xff]  ;;  %393 = vst.msk [vmem:[#allocation4] sm:$0xff] %vm391_vm2, %v1205_v1  ;;  %976 = vset.pattern.permute.xlu0 %v1208_v31  ;;  %977 = vset.pattern.permute.xlu1 %v1208_v31  ;;  %s832_s21 = sshll.u32 %s1186_s18, 7  ;;  %s305_s23 = scalar_lea.vmem [#allocation14], %s1448_s22 }
  0x9f   : > { %872 = vmatprep.subr.bf16.mxu1 %v871_v5  ;;  %v875_v14 = vpack.c.bf16 %v403_v12, %v401_v11  ;;  %v313_v16 = vld [vmem:[#allocation11 + $0x10] sm:$0xff]  ;;  %v314_v17 = vld [vmem:[#allocation11 + $0x18] sm:$0xff]  ;;  %v877_v18 = vpack.c.bf16 %v402_v15, %v400_v13  ;;  %v310_v21 = vld [vmem:[%s259_s27] sm:$0xff]  ;;  %s686_s14 = sshll.u32 %s305_s23, 4  ;;  %s1489_s6 = scalar_lea.hbm %s1542_s4, %s832_s21  ;;  %s1491_s14 = int_to_ptr.vmem [resolvable:$true] %s686_s14 }
  0xa0   : > { %874 = vmatpush1.bf16.msra.mxu1 %v873_v9  ;;  %867 = vmatpush3.bf16.msra.mxu0 %v866_v10  ;;  %v869_v19 = vpack.c.bf16 %v314_v17, %v313_v16  ;;  %v395_v20 = vld [vmem:[%s268_s26] sm:$0xff]  ;;  %s672_s13 = scalar_lea.sflag [#allocation8], %s1445_s2  ;;  %s1100_s3 = scalar_lea.vmem %s1491_s14, 128 }
  0xa1   : > { %876 = vmatprep.subr.bf16.mxu1 %v875_v14  ;;  %868 = vmatprep.subr.bf16.mxu0 %v1204_v0  ;;  %p1101_p1 = scmp.ne.s32.totalorder %s1491_s14, %s1100_s3  ;;  %p1566_p6 = scmp.ne.s32.totalorder %s1558_s29, 0 }
  0xa2   : > { %s1209_s18 = smov [#allocation14]  }
  0xa3   : > { %p1102_p10 = pnand %p1101_p1, %p1566_p6  ;;  %s1104_s30 = sshll.u32 %s1209_s18, 4  ;;  %s1105_s30 = int_to_ptr.vmem [resolvable:$false] %s1104_s30 }
  0xa4   : > { %878 = vmatpush1.bf16.msra.mxu1 %v877_v18  ;;  %870 = vmatpush3.bf16.msra.mxu0 %v869_v19  ;;  %v550_v32 = vld [vmem:[#allocation3] sm:$0xff]  ;;  %s1106_s10 = scalar_lea.vmem %s1105_s30, 256  ;;  %p1107_p4 = scmp.lt.s32.totalorder %s1491_s14, %s1105_s30 }
  0xa5   : > { %855 = vmatprep.subr.mxu0 %v1205_v1  ;;  %860 = vmatprep.subr.mxu1 %v1205_v1  ;;  %v567_v43 = vld [vmem:[#allocation4] sm:$0xff]  ;;  %p1103_p3 = pneg %p1102_p10  ;;  %p1108_p9 = scmp.lt.s32.totalorder %s1106_s10, %s1100_s3 }
  0xa7   : > { %829 = vmatmul.mubr.msk.f32.vlgmr.msra.gmra.mrb[0].mxu1 %vm315_vm1, %v395_v20  ;;  %853 = vmatmul.mubr.msk.f32.vlgmr.msra.gmra.mrb[0].mxu0 %vm315_vm1, %v310_v21  ;;  %p1109_p5 = por %p1108_p9, %p1107_p4 }
  0xa8   : > { %857 = vmatprep.mubr.msk.f32.mxu0 %vm1206_vm0, %v1205_v1  ;;  %862 = vmatprep.mubr.msk.f32.mxu1 %vm1206_vm0, %v1205_v1 }
  0xa9   : > { %p1110_p7 = pnand %p1109_p5, %p1103_p3 }
 0x17a   : > { %v474_v22 = vpop.f32.mrb[0].mxu1  ;;  %v385_v23 = vpop.f32.mrb[0].mxu0 }
 0x17b   : > { %v389_v24 = vmul.f32 0.25, %v385_v23  ;;  %v476_v25 = vpop.f32.mrb[1].mxu1  ;;  %856 = vmatpush3.xpose.msra.mxu0 %v474_v22  ;;  %v854_v26 = vpop.f32.mrb[1].mxu0 }
 0x17c   : > { %861 = vmatpush3.msra.mxu1 %v476_v25 }
 0x17e   : > { %858 = vmatmul.mubr.f32.vlgmr.msra.gmra.mrb[2].mxu0 %v389_v24 }
 0x251   : > { %v546_v28 = vpop.f32.mrb[2].mxu0 }
 0x252   : > { %v859_v29 = vpop.f32.mrb[3].mxu0  ;;  %v552_v30 = vsel %vm551_vm3, %v546_v28, -inf }
 0x253   : > { %553 = vmax.xlane.f32.xlu0 %v552_v30 }
 0x2e0   : > { %v554_v33 = vpop.xlane.xlu0 %553 }
 0x2e1   : > { %v555_v34 = vmax.f32 %v550_v32, %v554_v33 }
 0x2e3   : > { %v556_v35 = vsub.f32 %v550_v32, %v555_v34  ;;  %657 = vst.msk [vmem:[#allocation3] sm:$0xff] %vm391_vm2, %v555_v34  ;;  %561 = vperm.xlu0 %976, %v555_v34  }
 0x2e5   : > { %v557_v41 = vmul.f32 1.442695, %v556_v35 }
 0x362   : > { %v562_v36 = vpop.permute.xlu0 %561 }
 0x363   : > { %v564_v37 = vsub.f32 %v546_v28, %v562_v36 }
 0x365   : > { %v565_v38 = vmul.f32 1.442695, %v564_v37 }
 0x367   : > { %978 = vpow2.f32 %v565_v38 }
 0x368   : > { %980 = vpow2.f32 %v557_v41 }
 0x371   : > { %v979_v39 = vpop.eup %978 }
 0x372   : > { %863 = vmatmul.mubr.msk.f32.vlgmr.msra.gmra.mrb[2].mxu1 %vm551_vm3, %v979_v39  ;;  %v569_v40 = vsel %vm551_vm3, %v979_v39, 0.0  ;;  %v981_v42 = vpop.eup %980 }
 0x373   : > { %570 = vadd.xlane.f32.xlu1 %v569_v40  ;;  %v568_v44 = vmul.f32 %v981_v42, %v567_v43 }
 0x384   : > { %578 = vperm.xlu1 %977, %v981_v42  }
 0x400   : > { %v571_v45 = vpop.xlane.xlu1 %570 }
 0x401   : > { %v572_v46 = vadd.f32 %v571_v45, %v568_v44 }
 0x403   : > { %574 = vst.msk [vmem:[#allocation4] sm:$0xff] %vm391_vm2, %v572_v46 }
 0x404   : > { %v579_v51 = vpop.permute.xlu1 %578 }
 0x405   : > { %v581_v52 = vmul.f32 0.0, %v579_v51 }
 0x40a   : > { %v661_v47 = vld [vmem:[#allocation4] sm:$0xff] }
 0x40b   : > { %982 = vrcp.f32 %v661_v47 }
 0x415   : > { %v983_v48 = vpop.eup %982 }
 0x416   : > { %666 = vperm.xlu1 %977, %v983_v48  }
 0x445   : > { %v651_v49 = vpop.f32.mrb[2].mxu1 }
 0x446   : > { %v864_v50 = vpop.f32.mrb[3].mxu1  ;;  %v655_v53 = vadd.f32 %v651_v49, %v581_v52 }
 0x495   : > { %v667_v54 = vpop.permute.xlu1 %666 }
 0x496   : > { %v669_v55 = vmul.f32 %v667_v54, %v655_v53 }
 0x498   : > { %670 = vst [vmem:[%s305_s23] sm:$0xff] %v669_v55 }
 0x499   : > { %1113 = shalt.err (!%p1110_p7)
}
 0x49a   : > { %s1114_s11 = scalar_lea.hbm %s1489_s6, 128  ;;  %s1118_s22 = scalar_lea.hbm %s1542_s4, 256 }
 0x49b   : > { %p1115_p13 = scmp.ne.s32.totalorder %s1489_s6, %s1114_s11  ;;  %p1119_p2 = scmp.lt.u32.totalorder %s1489_s6, %s1542_s4 }
 0x49c   : > { %p1120_p12 = scmp.lt.u32.totalorder %s1118_s22, %s1114_s11  ;;  %p1122_p1 = scmp.lt.u32.totalorder %s1114_s11, %s1489_s6 }
 0x49d   : > { %p1116_p8 = pnand %p1115_p13, %p1566_p6 }
 0x49e   : > { %p1121_p0 = por %p1120_p12, %p1119_p2 }
 0x49f   : > { %p1117_p11 = pneg %p1116_p8 }
 0x4a0   : > { %p1123_p10 = por %p1122_p1, %p1121_p0 }
 0x4a2   : > { %p1124_p3 = pnand %p1123_p10, %p1117_p11 }
 0x4a4   : > { %1127 = shalt.err (!%p1124_p3)
}
 0x4a5   : > { %891 = dma.vmem_to_hbm [thread:$0]  (%p1566_p6), %s1491_s14, 128, %s1489_s6, %s672_s13  }
 0x4a6 PF: > { %s698_s25 = sand.u32 1, %s1174_s15   ;;  %p1567_p4 = scmp.ne.s32.totalorder %s1551_s24, 0 }
 0x4a7   : > { %p1568_p9 = scmp.ge.s32.totalorder %s1194_s20, 2  ;;  %s699_s12 = scalar_lea.sflag [#allocation8], %s698_s25 }
 0x4a9   : > { %p908_p5 = pnand %p1568_p9, %p1567_p4 }
 0x4ab   : > { %1169 = dma.done.wait (!%p908_p5), %s699_s12, 128  }
 0x4ac   : > { %1171 = vsyncadd (!%p908_p5), %s699_s12, 4294967168  ;;  %s24_s20 = sadd.s32 1, %s1194_s20   ;;  %s1569_s29 = sld [smem:[#allocation20_spill]] }
 0x4ad   : > { %p21_p7 = scmp.ge.s32.totalorder %s24_s20, 4   ;;  %s1570_s15 = smov %s1178_s16 }
 0x4ae   : > { %s1571_s16 = smov %s1182_s17  ;;  %s1572_s17 = smov %s1375_s7 }
 0x4af   : > { %s1573_s18 = smov %s1190_s19  ;;  %23 = sbr.rel (!%p21_p7) target bundleno = 12 (0xc), region = 110 }
 0x4b2   : > { %s1574_s19 = smov %s1569_s29 }
 0x4b6   :  { %704 = vsyncpa [#allocation7], 1 }
 0x4b7   :  { %706 = vsyncpa [#allocation7 + $0x1], 1 }
 0x4b8   :  { %707 = vsyncpa [#allocation10], 1 }
 0x4b9   :  { %709 = vsyncpa [#allocation10 + $0x1], 1 }
 0x4ba   :  { %710 = vsyncpa [#allocation13], 1 }
 0x4bb   :  { %711 = vsyncpa [#allocation8], 1 }
 0x4bc   :  { %713 = vsyncpa [#allocation8 + $0x1], 1 }

</bundles_post_ra>
